<compile_context>
chip_gen: v7x
topology: tpu7x:2x2x1
jax: 0.10.0
libtpu: 0.0.40
codegen_flags: <defaults>
</compile_context>

<pallas_src>
import jax
import jax.numpy as jnp
from jax.experimental import pallas as pl
from jax.experimental.pallas import tpu as pltpu


# ----------------------------- Pallas kernel ------------------------------

def _channel_attention_kernel(x_ref, w1_ref, w2_ref, o_ref):
    # x_ref : (tm, L) bf16 packed rows (PACK channel-groups of C side by side).
    # w*_ref: (L, L)  bf16 block-diagonal weights, (in, out) layout, resident.
    xb = x_ref[...]

    # fc[0]: Linear(C, C, bias=False) + ReLU   (applied per C-channel block)
    h = jnp.dot(xb, w1_ref[...], preferred_element_type=jnp.float32)
    h = jnp.maximum(h, 0.0)

    # fc[2]: Linear(C, C, bias=False) + Sigmoid (exact; exp runs on the EUP)
    g = jnp.dot(h.astype(jnp.bfloat16), w2_ref[...],
                preferred_element_type=jnp.float32)
    y = 1.0 / (1.0 + jnp.exp(-g))

    # Channel-attention gate.  Re-read x_ref here instead of holding the tile
    # across both matmuls (VMEM re-load is cheap; frees vregs).
    o_ref[...] = (x_ref[...].astype(jnp.float32) * y).astype(o_ref.dtype)


# ------------------------------- wrapper -----------------------------------

def _round_up(v, m):
    return ((v + m - 1) // m) * m


def _plan_rows(mp):
    """(tile_rows, padded_rows) for the packed-row axis.

    Small inputs run as a single block (grid steps are a serial loop with
    ~0.35us overhead each); large inputs use 1024-row tiles, which keeps the
    live VMEM footprint at a couple of MiB on every generation (well under
    v7x's 64 MiB) while reaching the measured ~85% of HBM roofline."""
    if mp <= 1024:
        t = _round_up(max(mp, 1), 8)
        return t, t
    t = 1024
    return t, _round_up(mp, t)


def channel_attention(x, w1, w2):
    """x: (B, N, C).  w1, w2: (C, C) torch nn.Linear layout (out, in), no bias."""
    B, N, C = x.shape
    M = B * N

    # Lane packing: when C divides 128, pack PACK rows per 128-lane row so
    # every vreg / store is lane-dense and the matmul K dimension is 128.
    pack = 128 // C if (C < 128 and 128 % C == 0) else 1
    lane = pack * C

    mp = pl.cdiv(M, pack)
    tm, mp_pad = _plan_rows(mp)
    m_pad = mp_pad * pack

    # Pad rows (zeros are harmless: they are sliced off below), pack, and cast
    # to bf16 once -> half the input HBM traffic of this bandwidth-bound op.
    x2 = x.reshape(M, C)
    if m_pad != M:
        x2 = jnp.pad(x2, ((0, m_pad - M), (0, 0)))
    xp = x2.reshape(mp_pad, lane).astype(jnp.bfloat16)

    # Block-diagonal (in, out) bf16 weights: one small VMEM-resident tile each.
    eye = jnp.eye(pack, dtype=jnp.float32)
    w1p = jnp.kron(eye, jnp.asarray(w1, jnp.float32).T).astype(jnp.bfloat16)
    w2p = jnp.kron(eye, jnp.asarray(w2, jnp.float32).T).astype(jnp.bfloat16)

    grid = (mp_pad // tm,)

    outp = pl.pallas_call(
        _channel_attention_kernel,
        out_shape=jax.ShapeDtypeStruct((mp_pad, lane), x.dtype),
        grid_spec=pltpu.PrefetchScalarGridSpec(
            num_scalar_prefetch=0,
            grid=grid,
            in_specs=[
                pl.BlockSpec((tm, lane), lambda i: (i, 0)),    # packed x rows
                pl.BlockSpec((lane, lane), lambda i: (0, 0)),  # W1 block-diag
                pl.BlockSpec((lane, lane), lambda i: (0, 0)),  # W2 block-diag
            ],
            out_specs=pl.BlockSpec((tm, lane), lambda i: (i, 0)),
        ),
        compiler_params=pltpu.CompilerParams(
            dimension_semantics=("parallel",)),
    )(xp, w1p, w2p)

    out = outp.reshape(m_pad, C)[:M]
    return out.reshape(B, N, C)


# ------------------------- pure-JAX reference -------------------------------

def reference_forward(x, w1, w2):
    y = jnp.maximum(x @ w1.T, 0.0)        # Linear(bias=False) + ReLU
    y = jax.nn.sigmoid(y @ w2.T)          # Linear(bias=False) + Sigmoid
    return x * y                          # x * y.expand_as(x)


# ------------------------------- main ---------------------------------------

if __name__ == "__main__":
    B, N, C = 2, 8, 32                    # batch=2, seq=8, channel=32

    root = jax.random.PRNGKey(0)
    kx, k1, k2 = jax.random.split(root, 3)
    x = jax.random.normal(kx, (B, N, C), jnp.float32)
    bound = 1.0 / (C ** 0.5)              # torch nn.Linear default init range
    w1 = jax.random.uniform(k1, (C, C), jnp.float32, -bound, bound)
    w2 = jax.random.uniform(k2, (C, C), jnp.float32, -bound, bound)

    out = jax.block_until_ready(channel_attention(x, w1, w2))
    ref = jax.block_until_ready(reference_forward(x, w1, w2))

    assert out.shape == (B, N, C)
    # bf16 inputs / bf16 MXU (f32 accumulate) => looser tolerance than pure f32.
    err = jnp.max(jnp.abs(out - ref))
    assert jnp.allclose(out, ref, rtol=5e-2, atol=5e-2), f"max abs err {err}"

    print("KERNEL_OK")
</pallas_src>

<mosaic_0001>
module attributes {stable_mosaic.version = 11 : i64} {
  func.func @_channel_attention_kernel(%arg0: i32, %arg1: memref<8x128xbf16, #tpu.memory_space<vmem>>, %arg2: memref<128x128xbf16, #tpu.memory_space<vmem>>, %arg3: memref<128x128xbf16, #tpu.memory_space<vmem>>, %arg4: memref<8x128xf32, #tpu.memory_space<vmem>>) attributes {dimension_semantics = [#tpu.dimension_semantics<parallel>], iteration_bounds = array<i64: 1>, scalar_prefetch = 0 : i64, scratch_operands = 0 : i64, tpu.core_type = #tpu.core_type<tc>, window_params = [{transform_indices = @transform_0, window_bounds = array<i64: 8, 128>}, {pipeline_mode = #tpu.pipeline_mode<synchronous>, transform_indices = @transform_1, window_bounds = array<i64: 128, 128>}, {pipeline_mode = #tpu.pipeline_mode<synchronous>, transform_indices = @transform_2, window_bounds = array<i64: 128, 128>}, {transform_indices = @transform_3, window_bounds = array<i64: 8, 128>}]} {
    %c0 = arith.constant 0 : index
    %c0_0 = arith.constant 0 : index
    %0 = vector.load %arg1[%c0, %c0_0] : memref<8x128xbf16, #tpu.memory_space<vmem>>, vector<8x128xbf16>
    %c0_1 = arith.constant 0 : index
    %c0_2 = arith.constant 0 : index
    %1 = vector.load %arg2[%c0_1, %c0_2] : memref<128x128xbf16, #tpu.memory_space<vmem>>, vector<128x128xbf16>
    %cst = arith.constant dense<0.000000e+00> : vector<8x128xf32>
    %2 = tpu.matmul %0, %1, %cst {dimension_numbers = #tpu.dot_dimension_numbers<[1], [0], [0], [1], [0, 0, 1, 1], [], []>} : vector<8x128xbf16>, vector<128x128xbf16>, vector<8x128xf32> -> vector<8x128xf32>
    %cst_3 = arith.constant 0.000000e+00 : f32
    %3 = vector.broadcast %cst_3 : f32 to vector<8x128xf32>
    %4 = arith.maximumf %2, %3 : vector<8x128xf32>
    %5 = arith.truncf %4 : vector<8x128xf32> to vector<8x128xbf16>
    %c0_4 = arith.constant 0 : index
    %c0_5 = arith.constant 0 : index
    %6 = vector.load %arg3[%c0_4, %c0_5] : memref<128x128xbf16, #tpu.memory_space<vmem>>, vector<128x128xbf16>
    %cst_6 = arith.constant dense<0.000000e+00> : vector<8x128xf32>
    %7 = tpu.matmul %5, %6, %cst_6 {dimension_numbers = #tpu.dot_dimension_numbers<[1], [0], [0], [1], [0, 0, 1, 1], [], []>} : vector<8x128xbf16>, vector<128x128xbf16>, vector<8x128xf32> -> vector<8x128xf32>
    %cst_7 = arith.constant 0.000000e+00 : f32
    %8 = vector.broadcast %cst_7 : f32 to vector<8x128xf32>
    %9 = arith.subf %8, %7 : vector<8x128xf32>
    %10 = math.exp %9 : vector<8x128xf32>
    %cst_8 = arith.constant 1.000000e+00 : f32
    %11 = vector.broadcast %cst_8 : f32 to vector<8x128xf32>
    %12 = arith.addf %11, %10 : vector<8x128xf32>
    %cst_9 = arith.constant 1.000000e+00 : f32
    %13 = vector.broadcast %cst_9 : f32 to vector<8x128xf32>
    %14 = arith.divf %13, %12 : vector<8x128xf32>
    %c0_10 = arith.constant 0 : index
    %c0_11 = arith.constant 0 : index
    %15 = vector.load %arg1[%c0_10, %c0_11] : memref<8x128xbf16, #tpu.memory_space<vmem>>, vector<8x128xbf16>
    %16 = arith.extf %15 : vector<8x128xbf16> to vector<8x128xf32>
    %17 = arith.mulf %16, %14 : vector<8x128xf32>
    %c0_12 = arith.constant 0 : index
    %c0_13 = arith.constant 0 : index
    %18 = vector.load %arg4[%c0_12, %c0_13] : memref<8x128xf32, #tpu.memory_space<vmem>>, vector<8x128xf32>
    tpu.vector_store %arg4[%c0_12, %c0_13], %17 {strides = array<i32>} : memref<8x128xf32, #tpu.memory_space<vmem>>, vector<8x128xf32>,
    return
  }
  func.func @transform_0(%arg0: i32) -> (i32, i32) {
    %c0_i32 = arith.constant 0 : i32
    %c0_i32_0 = arith.constant 0 : i32
    return %arg0, %c0_i32 : i32, i32
  }
  func.func @transform_1(%arg0: i32) -> (i32, i32) {
    %c0_i32 = arith.constant 0 : i32
    %c0_i32_0 = arith.constant 0 : i32
    %c0_i32_1 = arith.constant 0 : i32
    return %c0_i32, %c0_i32_0 : i32, i32
  }
  func.func @transform_2(%arg0: i32) -> (i32, i32) {
    %c0_i32 = arith.constant 0 : i32
    %c0_i32_0 = arith.constant 0 : i32
    %c0_i32_1 = arith.constant 0 : i32
    return %c0_i32, %c0_i32_0 : i32, i32
  }
  func.func @transform_3(%arg0: i32) -> (i32, i32) {
    %c0_i32 = arith.constant 0 : i32
    %c0_i32_0 = arith.constant 0 : i32
    return %arg0, %c0_i32 : i32, i32
  }
}

</mosaic_0001>

<bundles_post_ra>
// kernel: tpu_custom_call.1
= control target key start
LH: loop header
LB: loop body
LE: loop exit
PB: predicated region body
PF: predicated region fallthrough
CT: control target
= control target key end

     0   :  { %8 = vsyncpa [#allocation3], 0  ;;  %s569_s0 = inlined_call_operand.hbm [shape: bf16[8,128], index: 0, kind: input, shape index: {}]   ;;  %s570_s1 = inlined_call_operand.hbm [shape: bf16[128,128], index: 1, kind: input, shape index: {}]   ;;  %s571_s2 = inlined_call_operand.hbm [shape: bf16[128,128], index: 2, kind: input, shape index: {}]   ;;  %s572_s3 = inlined_call_operand.hbm [shape: f32[8,128], index: 3, kind: output, shape index: {}]  }
   0x1   :  { %9 = vsyncpa [#allocation6], 0 }
   0x2   :  { %10 = vsyncpa [#allocation4], 0  ;;  %s487_s12 = smov [#allocation5]   ;;  %s393_s16 = scalar_lea.hbm %s570_s1, 1024 }
   0x3   :  { %s26_s13 = sshll.u32 %s487_s12, 4  ;;  %p394_p0 = scmp.ne.s32.totalorder %s570_s1, %s393_s16  ;;  %s27_s13 = int_to_ptr.vmem [resolvable:$true] %s26_s13 }
   0x4   :  { %p397_p1 = scmp.lt.u32.totalorder %s393_s16, %s570_s1 }
   0x6   :  { %p399_p2 = pnand %p397_p1, %p394_p0 }
   0x8   :  { %402 = shalt.err (!%p399_p2)
}
   0x9   :  { %s403_s21 = scalar_lea.vmem %s27_s13, 1024  ;;  %p408_p4 = scmp.lt.s32.totalorder %s27_s13, %s27_s13 }
   0xa   :  { %p404_p3 = scmp.ne.s32.totalorder %s27_s13, %s403_s21  ;;  %p409_p5 = scmp.lt.s32.totalorder %s403_s21, %s403_s21 }
   0xc   :  { %p410_p6 = por %p409_p5, %p408_p4 }
   0xe   :  { %p411_p7 = pnand %p410_p6, %p404_p3 }
  0x10   :  { %414 = shalt.err (!%p411_p7)
}
  0x11   :  { %s488_s22 = smov 64   ;;  %s489_s23 = smov 4  }
  0x12   :  { %32 = dma.hbm_to_vmem [thread:$0]  %s570_s1, 1024, %s27_s13, [#allocation6], %s488_s22, %s488_s22, %s489_s23  }
  0x13   :  { %s490_s26 = smov [#allocation2]   ;;  %s491_s28 = smov [#allocation7]  }
  0x14   :  { %s17_s27 = sshll.u32 %s490_s26, 4  ;;  %s38_s29 = sshll.u32 %s491_s28, 4  ;;  %s18_s27 = int_to_ptr.vmem [resolvable:$true] %s17_s27  ;;  %s39_s29 = int_to_ptr.vmem [resolvable:$true] %s38_s29 }
  0x15   :  { %s415_s5 = scalar_lea.hbm %s569_s0, 64 }
  0x16   :  { %p416_p8 = scmp.ne.s32.totalorder %s569_s0, %s415_s5  ;;  %p419_p9 = scmp.lt.u32.totalorder %s415_s5, %s569_s0 }
  0x18   :  { %p421_p10 = pnand %p419_p9, %p416_p8 }
  0x1a   :  { %424 = shalt.err (!%p421_p10)
}
  0x1b   :  { %s425_s1 = scalar_lea.vmem %s18_s27, 64  ;;  %p430_p12 = scmp.lt.s32.totalorder %s18_s27, %s18_s27 }
  0x1c   :  { %p426_p11 = scmp.ne.s32.totalorder %s18_s27, %s425_s1  ;;  %p431_p13 = scmp.lt.s32.totalorder %s425_s1, %s425_s1 }
  0x1e   :  { %p432_p0 = por %p431_p13, %p430_p12 }
  0x20   :  { %p433_p1 = pnand %p432_p0, %p426_p11 }
  0x22   :  { %436 = shalt.err (!%p433_p1)
}
  0x23   :  { %20 = dma.hbm_to_vmem [thread:$0]  %s569_s0, 64, %s18_s27, [#allocation3]  }
  0x24   :  { %s437_s14 = scalar_lea.hbm %s571_s2, 1024 }
  0x25   :  { %p438_p2 = scmp.ne.s32.totalorder %s571_s2, %s437_s14  ;;  %p441_p3 = scmp.lt.u32.totalorder %s437_s14, %s571_s2 }
  0x27   :  { %p443_p4 = pnand %p441_p3, %p438_p2 }
  0x29   :  { %446 = shalt.err (!%p443_p4)
}
  0x2a   :  { %s447_s19 = scalar_lea.vmem %s39_s29, 1024  ;;  %p452_p6 = scmp.lt.s32.totalorder %s39_s29, %s39_s29 }
  0x2b   :  { %p448_p5 = scmp.ne.s32.totalorder %s39_s29, %s447_s19  ;;  %p453_p7 = scmp.lt.s32.totalorder %s447_s19, %s447_s19 }
  0x2d   :  { %p454_p8 = por %p453_p7, %p452_p6 }
  0x2f   :  { %p455_p9 = pnand %p454_p8, %p448_p5 }
  0x31   :  { %458 = shalt.err (!%p455_p9)
}
  0x32   :  { %44 = dma.hbm_to_vmem [thread:$0]  %s571_s2, 1024, %s39_s29, [#allocation6], %s488_s22, %s488_s22, %s489_s23  }
  0x33   :  { %481 = dma.done.wait [#allocation3], 64  }
  0x34   :  { %482 = vsyncadd [#allocation3], 4294967232 }
  0x35   :  { %483 = dma.done.wait [#allocation6], 2048  }
  0x36   :  { %484 = vsyncadd [#allocation6], 4294965248  ;;  %v492_v0 = vmov 0.0   ;;  %vm493_vm0 = vmmov 0   ;;  %v373_v1 = vld [vmem:[#allocation5] sm:$0xff]   ;;  %v374_v2 = vld [vmem:[#allocation5 + $0x8] sm:$0xff]  }
  0x37   :  { %325 = vmatprep.subr.bf16.mxu0 %v492_v0  ;;  %341 = vmatprep.mubr.msk.bf16.mxu0 %vm493_vm0, %v492_v0  ;;  %v375_v3 = vld [vmem:[#allocation5 + $0x10] sm:$0xff]   ;;  %v381_v4 = vld [vmem:[#allocation7] sm:$0xff]   ;;  %v376_v5 = vld [vmem:[#allocation5 + $0x18] sm:$0xff]   ;;  %s494_s2 = smov [#allocation8]  }
  0x38   :  { %345 = vmatprep.subr.bf16.mxu1 %v492_v0  ;;  %361 = vmatprep.mubr.msk.bf16.mxu1 %vm493_vm0, %v492_v0  ;;  %v382_v6 = vld [vmem:[#allocation7 + $0x8] sm:$0xff]   ;;  %v377_v7 = vld [vmem:[#allocation5 + $0x20] sm:$0xff]   ;;  %v383_v8 = vld [vmem:[#allocation7 + $0x10] sm:$0xff]   ;;  %s281_s21 = sshll.u32 %s494_s2, 4  ;;  %s282_s21 = int_to_ptr.vmem [resolvable:$true] %s281_s21 }
  0x39   :  { %326 = vmatpush3.bf16.msra.mxu0 %v373_v1  ;;  %346 = vmatpush3.bf16.msra.mxu1 %v381_v4  ;;  %v378_v9 = vld [vmem:[#allocation5 + $0x28] sm:$0xff]   ;;  %v384_v10 = vld [vmem:[#allocation7 + $0x18] sm:$0xff]   ;;  %v379_v11 = vld [vmem:[#allocation5 + $0x30] sm:$0xff]   ;;  %s459_s22 = scalar_lea.vmem %s282_s21, 128  ;;  %p464_p11 = scmp.lt.s32.totalorder %s282_s21, %s282_s21 }
  0x3a   :  { %327 = vmatprep.subr.bf16.mxu0 %v492_v0  ;;  %347 = vmatprep.subr.bf16.mxu1 %v492_v0  ;;  %v385_v12 = vld [vmem:[#allocation7 + $0x20] sm:$0xff]   ;;  %v380_v13 = vld [vmem:[#allocation5 + $0x38] sm:$0xff]   ;;  %v386_v14 = vld [vmem:[#allocation7 + $0x28] sm:$0xff]   ;;  %p460_p10 = scmp.ne.s32.totalorder %s282_s21, %s459_s22  ;;  %p465_p12 = scmp.lt.s32.totalorder %s459_s22, %s459_s22 }
  0x3b   :  { %v55_v15 = vld [vmem:[#allocation2] sm:$0xf]  ;;  %v387_v16 = vld [vmem:[#allocation7 + $0x30] sm:$0xff]  }
  0x3c   :  { %v388_v17 = vld [vmem:[#allocation7 + $0x38] sm:$0xff]   ;;  %v272_v32 = vunpack.c.l.bf16 %v55_v15  ;;  %p466_p13 = por %p465_p12, %p464_p11 }
  0x3d   :  { %328 = vmatpush3.bf16.msra.mxu0 %v374_v2  ;;  %348 = vmatpush3.bf16.msra.mxu1 %v382_v6 }
  0x3e   :  { %329 = vmatprep.subr.bf16.mxu0 %v492_v0  ;;  %349 = vmatprep.subr.bf16.mxu1 %v492_v0  ;;  %p467_p0 = pnand %p466_p13, %p460_p10 }
  0x41   :  { %330 = vmatpush3.bf16.msra.mxu0 %v375_v3  ;;  %350 = vmatpush3.bf16.msra.mxu1 %v383_v8 }
  0x42   :  { %331 = vmatprep.subr.bf16.mxu0 %v492_v0  ;;  %351 = vmatprep.subr.bf16.mxu1 %v492_v0 }
  0x45   :  { %332 = vmatpush3.bf16.msra.mxu0 %v376_v5  ;;  %352 = vmatpush3.bf16.msra.mxu1 %v384_v10 }
  0x46   :  { %333 = vmatprep.subr.bf16.mxu0 %v492_v0  ;;  %353 = vmatprep.subr.bf16.mxu1 %v492_v0 }
  0x49   :  { %334 = vmatpush3.bf16.msra.mxu0 %v377_v7  ;;  %354 = vmatpush3.bf16.msra.mxu1 %v385_v12 }
  0x4a   :  { %335 = vmatprep.subr.bf16.mxu0 %v492_v0  ;;  %355 = vmatprep.subr.bf16.mxu1 %v492_v0 }
  0x4d   :  { %336 = vmatpush3.bf16.msra.mxu0 %v378_v9  ;;  %356 = vmatpush3.bf16.msra.mxu1 %v386_v14 }
  0x4e   :  { %337 = vmatprep.subr.bf16.mxu0 %v492_v0  ;;  %357 = vmatprep.subr.bf16.mxu1 %v492_v0 }
  0x51   :  { %338 = vmatpush3.bf16.msra.mxu0 %v379_v11  ;;  %358 = vmatpush3.bf16.msra.mxu1 %v387_v16 }
  0x52   :  { %339 = vmatprep.subr.bf16.mxu0 %v492_v0  ;;  %359 = vmatprep.subr.bf16.mxu1 %v492_v0 }
  0x55   :  { %340 = vmatpush3.bf16.msra.mxu0 %v380_v13  ;;  %360 = vmatpush3.bf16.msra.mxu1 %v388_v17 }
  0x58   :  { %342 = vmatmul.mubr.bf16.vlgmr.msra.gmra.mrb[0].mxu0 %v55_v15 }
 0x12b   :  { %v154_v18 = vpop.f32.mrb[0].mxu0 }
 0x12c   :  { %v160_v19 = vmax.f32 %v154_v18, 0.0  ;;  %v343_v20 = vpop.f32.mrb[1].mxu0 }
 0x12d   :  { %v157_v21 = vpop.f32.mrb[2].mxu0 }
 0x12e   :  { %v161_v22 = vpack.c.bf16 %v160_v19, %v160_v19  ;;  %v344_v23 = vpop.f32.mrb[3].mxu0 }
 0x130   :  { %362 = vmatmul.mubr.bf16.vlgmr.msra.gmra.mrb[0].mxu1 %v161_v22 }
 0x203   :  { %v260_v24 = vpop.f32.mrb[0].mxu1 }
 0x204   :  { %v266_v25 = vsub.f32 0.0, %v260_v24  ;;  %v363_v26 = vpop.f32.mrb[1].mxu1 }
 0x205   :  { %v263_v27 = vpop.f32.mrb[2].mxu1 }
 0x206   :  { %v267_v28 = vmul.f32 1.442695, %v266_v25  ;;  %v364_v29 = vpop.f32.mrb[3].mxu1 }
 0x208   :  { %389 = vpow2.f32 %v267_v28 }
 0x212   :  { %v390_v30 = vpop.eup %389 }
 0x213   :  { %v269_v31 = vadd.f32 1.0, %v390_v30 }
 0x215   :  { %391 = vrcp.f32 %v269_v31 }
 0x21f   :  { %v392_v33 = vpop.eup %391 }
 0x220   :  { %v273_v34 = vmul.f32 %v392_v33, %v272_v32 }
 0x222   :  { %274 = vst [vmem:[#allocation8] sm:$0xff] %v273_v34 }
 0x223   :  { %470 = shalt.err (!%p467_p0)
}
 0x224   :  { %s471_s25 = scalar_lea.hbm %s572_s3, 128 }
 0x225   :  { %p472_p1 = scmp.ne.s32.totalorder %s572_s3, %s471_s25  ;;  %p475_p2 = scmp.lt.u32.totalorder %s471_s25, %s572_s3 }
 0x227   :  { %p477_p3 = pnand %p475_p2, %p472_p1 }
 0x229   :  { %480 = shalt.err (!%p477_p3)
}
 0x22a   :  { %284 = dma.vmem_to_hbm [thread:$0]  %s282_s21, 128, %s572_s3, [#allocation4]  }
 0x22b   :  { %485 = dma.done.wait [#allocation4], 128  }
 0x22c   :  { %486 = vsyncadd [#allocation4], 4294967168 }
 0x22d   :  { %288 = vsyncpa [#allocation3], 1 }
 0x22e   :  { %289 = vsyncpa [#allocation6], 1 }
 0x22f   :  { %290 = vsyncpa [#allocation4], 1 }

</bundles_post_ra>
